<compile_context>
chip_gen: v7x
topology: tpu7x:2x2x1
jax: 0.10.0
libtpu: 0.0.40
codegen_flags: <defaults>
</compile_context>

<pallas_src>
import numpy as np
import jax
import jax.numpy as jnp
from jax import lax
from jax.experimental import pallas as pl
from jax.experimental.pallas import tpu as pltpu


_VC = 8  # vocab ids handled per sublane chunk (one vreg sublane group)


def _round_up(a: int, b: int) -> int:
    return (a + b - 1) // b * b


def _features_linear_kernel(idx_ref, w_ref, b_ref, o_ref):
    # idx_ref: (F, TB)          int32  per-field global ids, batch on LANES
    # w_ref:   (Dout*8, Vp//8)  f32    packed weight, VMEM-resident:
    #                                  w_ref[d*8 + s, c] == W[d, c*8 + s]
    # b_ref:   (Dout, 1)        f32    bias, VMEM-resident
    # o_ref:   (Dout, TB)       f32    lane-dense output tile (batch on lanes)
    num_fields, tb = idx_ref.shape
    dout = o_ref.shape[0]
    n_chunks = w_ref.shape[1]

    idx = idx_ref[...]            # (F, TB) int32
    w_packed = w_ref[...]         # (Dout*8, Vp//8) f32
    bias = b_ref[...]             # (Dout, 1) f32

    # Sublane iota, hoisted: row s of chunk c corresponds to vocab id c*8 + s.
    sub_iota = lax.broadcasted_iota(jnp.int32, (_VC, tb), 0)

    acc = [jnp.zeros((1, tb), jnp.float32) for _ in range(dout)]
    for c in range(n_chunks):                      # static: vocab ids [8c, 8c+8)
        # count[s, b] = number of fields whose id equals c*8 + s
        # (0 or 1 for valid FM inputs, since per-field offsets are disjoint).
        count = jnp.zeros((_VC, tb), jnp.float32)
        for f in range(num_fields):                # static, small
            ids_f = idx[f:f + 1, :] - c * _VC      # (1, TB)
            count = count + jnp.where(sub_iota == ids_f, 1.0, 0.0)
        for d in range(dout):                      # static (Dout == 1 for FM)
            w_col = jnp.broadcast_to(
                w_packed[d * _VC:(d + 1) * _VC, c:c + 1], (_VC, tb))
            acc[d] = acc[d] + jnp.sum(count * w_col, axis=0, keepdims=True)

    out = acc[0] if dout == 1 else jnp.concatenate(acc, axis=0)   # (Dout, TB)
    o_ref[...] = out + bias       # one dense (Dout, TB) store per tile


def features_linear(x, offsets, weight, bias, *, tile_b=1024):
    """FeaturesLinear forward.

    x:       (B, F) int32 label-encoded feature ids per field
    offsets: (F,)   int32 cumulative field offsets (prepended 0)
    weight:  (Dout, V) float32  (nn.Linear weight, V = sum(field_dims))
    bias:    (Dout,)   float32
    returns: (B, Dout) float32
    """
    B, F = x.shape
    Dout, V = weight.shape

    # Fold the per-field offsets in the wrapper; kernel only sees final ids.
    idx = x.astype(jnp.int32) + offsets.astype(jnp.int32)[None, :]   # (B, F)

    # Batch tile on the LANE axis (multiple of 128).  Prefer >= 2 tiles so the
    # "parallel" grid axis can actually feed both v7x TensorCores.
    lanes = _round_up(B, 128)
    TB = min(_round_up(max(int(tile_b), 128), 128), lanes)
    if lanes // TB < 2 and lanes >= 2 * 128:
        TB = _round_up(lanes // 2, 128)
    Bp = _round_up(B, TB)

    # Batch on the lane axis: (F, Bp); padded columns use id 0 (sliced off).
    idx_t = jnp.transpose(idx)
    if Bp != B:
        idx_t = jnp.pad(idx_t, ((0, 0), (0, Bp - B)))

    # Pack the weight so every chunk of 8 consecutive vocab ids is a sublane
    # column: w_packed[d*8 + s, c] = W[d, c*8 + s].  This keeps the resident
    # table lane-dense (~4*V*Dout bytes) -- no (V, Dout) lane-padded column.
    Vp = _round_up(V, _VC)
    w_pad = jnp.pad(weight.astype(jnp.float32), ((0, 0), (0, Vp - V)))
    w_packed = jnp.swapaxes(
        w_pad.reshape(Dout, Vp // _VC, _VC), 1, 2).reshape(Dout * _VC, Vp // _VC)

    bias2d = bias.reshape(Dout, 1).astype(jnp.float32)

    out_t = pl.pallas_call(
        _features_linear_kernel,
        out_shape=jax.ShapeDtypeStruct((Dout, Bp), jnp.float32),
        grid=(Bp // TB,),
        in_specs=[
            # Tiled VMEM index block (no SMEM scalar prefetch).
            pl.BlockSpec((F, TB), lambda i: (0, i)),
            # Constant index maps -> weight / bias stay VMEM-resident.
            pl.BlockSpec((Dout * _VC, Vp // _VC), lambda i: (0, 0)),
            pl.BlockSpec((Dout, 1), lambda i: (0, 0)),
        ],
        out_specs=pl.BlockSpec((Dout, TB), lambda i: (0, i)),
        compiler_params=pltpu.CompilerParams(
            dimension_semantics=("parallel",),   # independent batch tiles
            # Modest explicit budget (fits v7x's 64 MiB/TC with headroom); the
            # per-step footprint here is only tens of KiB.
            vmem_limit_bytes=32 * 1024 * 1024,
        ),
    )(idx_t, w_packed, bias2d)

    return jnp.transpose(out_t)[:B]              # (B, Dout)


if __name__ == "__main__":
    # Toy config consistent with the FM module.
    field_dims = [3, 5, 4, 7]
    output_dim = 1
    batch = 32
    num_fields = len(field_dims)
    vocab = sum(field_dims)

    key = jax.random.PRNGKey(0)
    k_w, k_x = jax.random.split(key)

    # nn.Linear init from _initialize_weights: weight ~ N(0, 0.01), bias = 0.
    weight = (0.01 * jax.random.normal(k_w, (output_dim, vocab))).astype(jnp.float32)
    bias = jnp.zeros((output_dim,), jnp.float32)

    # Label-encoded inputs: x[:, f] in [0, field_dims[f]).
    maxvals = jnp.asarray(field_dims, dtype=jnp.int32)
    x = (jax.random.randint(k_x, (batch, num_fields), 0, 1 << 20, dtype=jnp.int32)
         % maxvals[None, :]).astype(jnp.int32)

    # offsets = concat([[0], cumsum(field_dims)[:-1]])
    offsets = jnp.asarray(
        np.concatenate([[0], np.cumsum(field_dims)[:-1]]).astype(np.int32))

    out = features_linear(x, offsets, weight, bias)
    out = jax.block_until_ready(out)

    # Pure-JAX reference mirroring the PyTorch forward: multi-hot + Linear.
    # (With valid inputs the per-field ids are disjoint, so the sum of one-hots
    #  equals the scatter_(…, 1) multi-hot.)
    idx_ref = x + offsets[None, :]
    multi_hot = jax.nn.one_hot(idx_ref, vocab, dtype=jnp.float32).sum(axis=1)  # (B, V)
    ref = multi_hot @ weight.T + bias[None, :]                                 # (B, Dout)

    assert out.shape == (batch, output_dim)
    np.testing.assert_allclose(np.asarray(out), np.asarray(ref), rtol=1e-6, atol=1e-6)

    print("KERNEL_OK")
</pallas_src>

<mosaic_0001>
module attributes {stable_mosaic.version = 11 : i64} {
  func.func @_features_linear_kernel(%arg0: i32, %arg1: memref<4x128xi32, #tpu.memory_space<vmem>>, %arg2: memref<8x3xf32, #tpu.memory_space<vmem>>, %arg3: memref<1x1xf32, #tpu.memory_space<vmem>>, %arg4: memref<1x128xf32, #tpu.memory_space<vmem>>) attributes {dimension_semantics = [#tpu.dimension_semantics<parallel>], iteration_bounds = array<i64: 1>, scalar_prefetch = 0 : i64, scratch_operands = 0 : i64, tpu.core_type = #tpu.core_type<tc>, window_params = [{transform_indices = @transform_0, window_bounds = array<i64: 4, 128>}, {pipeline_mode = #tpu.pipeline_mode<synchronous>, transform_indices = @transform_1, window_bounds = array<i64: 8, 3>}, {pipeline_mode = #tpu.pipeline_mode<synchronous>, transform_indices = @transform_2, window_bounds = array<i64: 1, 1>}, {transform_indices = @transform_3, window_bounds = array<i64: 1, 128>}]} {
    %c0 = arith.constant 0 : index
    %c0_0 = arith.constant 0 : index
    %0 = vector.load %arg1[%c0, %c0_0] : memref<4x128xi32, #tpu.memory_space<vmem>>, vector<4x128xi32>
    %c0_1 = arith.constant 0 : index
    %c0_2 = arith.constant 0 : index
    %1 = vector.load %arg2[%c0_1, %c0_2] : memref<8x3xf32, #tpu.memory_space<vmem>>, vector<8x3xf32>
    %c0_3 = arith.constant 0 : index
    %c0_4 = arith.constant 0 : index
    %2 = vector.load %arg3[%c0_3, %c0_4] : memref<1x1xf32, #tpu.memory_space<vmem>>, vector<1x1xf32>
    %3 = tpu.iota {dimensions = array<i32: 0>} : vector<8x128xi32>
    %cst = arith.constant 0.000000e+00 : f32
    %4 = vector.broadcast %cst : f32 to vector<1x128xf32>
    %cst_5 = arith.constant 0.000000e+00 : f32
    %5 = vector.broadcast %cst_5 : f32 to vector<8x128xf32>
    %6 = vector.extract_strided_slice %0 {offsets = [0, 0], sizes = [1, 128], strides = [1, 1]} : vector<4x128xi32> to vector<1x128xi32>
    %c0_i32 = arith.constant 0 : i32
    %7 = vector.broadcast %c0_i32 : i32 to vector<1x128xi32>
    %8 = arith.subi %6, %7 : vector<1x128xi32>
    %9 = vector.broadcast %8 : vector<1x128xi32> to vector<8x128xi32>
    %10 = arith.cmpi eq, %3, %9 : vector<8x128xi32>
    %cst_6 = arith.constant 1.000000e+00 : f32
    %cst_7 = arith.constant 0.000000e+00 : f32
    %11 = vector.broadcast %cst_6 : f32 to vector<8x128xf32>
    %12 = vector.broadcast %cst_7 : f32 to vector<8x128xf32>
    %13 = arith.select %10, %11, %12 : vector<8x128xi1>, vector<8x128xf32>
    %14 = arith.addf %5, %13 : vector<8x128xf32>
    %15 = vector.extract_strided_slice %0 {offsets = [1, 0], sizes = [1, 128], strides = [1, 1]} : vector<4x128xi32> to vector<1x128xi32>
    %c0_i32_8 = arith.constant 0 : i32
    %16 = vector.broadcast %c0_i32_8 : i32 to vector<1x128xi32>
    %17 = arith.subi %15, %16 : vector<1x128xi32>
    %18 = vector.broadcast %17 : vector<1x128xi32> to vector<8x128xi32>
    %19 = arith.cmpi eq, %3, %18 : vector<8x128xi32>
    %cst_9 = arith.constant 1.000000e+00 : f32
    %cst_10 = arith.constant 0.000000e+00 : f32
    %20 = vector.broadcast %cst_9 : f32 to vector<8x128xf32>
    %21 = vector.broadcast %cst_10 : f32 to vector<8x128xf32>
    %22 = arith.select %19, %20, %21 : vector<8x128xi1>, vector<8x128xf32>
    %23 = arith.addf %14, %22 : vector<8x128xf32>
    %24 = vector.extract_strided_slice %0 {offsets = [2, 0], sizes = [1, 128], strides = [1, 1]} : vector<4x128xi32> to vector<1x128xi32>
    %c0_i32_11 = arith.constant 0 : i32
    %25 = vector.broadcast %c0_i32_11 : i32 to vector<1x128xi32>
    %26 = arith.subi %24, %25 : vector<1x128xi32>
    %27 = vector.broadcast %26 : vector<1x128xi32> to vector<8x128xi32>
    %28 = arith.cmpi eq, %3, %27 : vector<8x128xi32>
    %cst_12 = arith.constant 1.000000e+00 : f32
    %cst_13 = arith.constant 0.000000e+00 : f32
    %29 = vector.broadcast %cst_12 : f32 to vector<8x128xf32>
    %30 = vector.broadcast %cst_13 : f32 to vector<8x128xf32>
    %31 = arith.select %28, %29, %30 : vector<8x128xi1>, vector<8x128xf32>
    %32 = arith.addf %23, %31 : vector<8x128xf32>
    %33 = vector.extract_strided_slice %0 {offsets = [3, 0], sizes = [1, 128], strides = [1, 1]} : vector<4x128xi32> to vector<1x128xi32>
    %c0_i32_14 = arith.constant 0 : i32
    %34 = vector.broadcast %c0_i32_14 : i32 to vector<1x128xi32>
    %35 = arith.subi %33, %34 : vector<1x128xi32>
    %36 = vector.broadcast %35 : vector<1x128xi32> to vector<8x128xi32>
    %37 = arith.cmpi eq, %3, %36 : vector<8x128xi32>
    %cst_15 = arith.constant 1.000000e+00 : f32
    %cst_16 = arith.constant 0.000000e+00 : f32
    %38 = vector.broadcast %cst_15 : f32 to vector<8x128xf32>
    %39 = vector.broadcast %cst_16 : f32 to vector<8x128xf32>
    %40 = arith.select %37, %38, %39 : vector<8x128xi1>, vector<8x128xf32>
    %41 = arith.addf %32, %40 : vector<8x128xf32>
    %42 = vector.extract_strided_slice %1 {offsets = [0, 0], sizes = [8, 1], strides = [1, 1]} : vector<8x3xf32> to vector<8x1xf32>
    %43 = vector.shape_cast %42 : vector<8x1xf32> to vector<8x1xf32>
    %44 = vector.broadcast %43 : vector<8x1xf32> to vector<8x128xf32>
    %45 = arith.mulf %41, %44 : vector<8x128xf32>
    %cst_17 = arith.constant dense<0.000000e+00> : vector<128xf32>
    %46 = vector.multi_reduction <add>, %45, %cst_17 [0] : vector<8x128xf32> to vector<128xf32>
    %47 = vector.shape_cast %46 : vector<128xf32> to vector<1x128xf32>
    %48 = arith.addf %4, %47 : vector<1x128xf32>
    %cst_18 = arith.constant 0.000000e+00 : f32
    %49 = vector.broadcast %cst_18 : f32 to vector<8x128xf32>
    %50 = vector.extract_strided_slice %0 {offsets = [0, 0], sizes = [1, 128], strides = [1, 1]} : vector<4x128xi32> to vector<1x128xi32>
    %c8_i32 = arith.constant 8 : i32
    %51 = vector.broadcast %c8_i32 : i32 to vector<1x128xi32>
    %52 = arith.subi %50, %51 : vector<1x128xi32>
    %53 = vector.broadcast %52 : vector<1x128xi32> to vector<8x128xi32>
    %54 = arith.cmpi eq, %3, %53 : vector<8x128xi32>
    %cst_19 = arith.constant 1.000000e+00 : f32
    %cst_20 = arith.constant 0.000000e+00 : f32
    %55 = vector.broadcast %cst_19 : f32 to vector<8x128xf32>
    %56 = vector.broadcast %cst_20 : f32 to vector<8x128xf32>
    %57 = arith.select %54, %55, %56 : vector<8x128xi1>, vector<8x128xf32>
    %58 = arith.addf %49, %57 : vector<8x128xf32>
    %59 = vector.extract_strided_slice %0 {offsets = [1, 0], sizes = [1, 128], strides = [1, 1]} : vector<4x128xi32> to vector<1x128xi32>
    %c8_i32_21 = arith.constant 8 : i32
    %60 = vector.broadcast %c8_i32_21 : i32 to vector<1x128xi32>
    %61 = arith.subi %59, %60 : vector<1x128xi32>
    %62 = vector.broadcast %61 : vector<1x128xi32> to vector<8x128xi32>
    %63 = arith.cmpi eq, %3, %62 : vector<8x128xi32>
    %cst_22 = arith.constant 1.000000e+00 : f32
    %cst_23 = arith.constant 0.000000e+00 : f32
    %64 = vector.broadcast %cst_22 : f32 to vector<8x128xf32>
    %65 = vector.broadcast %cst_23 : f32 to vector<8x128xf32>
    %66 = arith.select %63, %64, %65 : vector<8x128xi1>, vector<8x128xf32>
    %67 = arith.addf %58, %66 : vector<8x128xf32>
    %68 = vector.extract_strided_slice %0 {offsets = [2, 0], sizes = [1, 128], strides = [1, 1]} : vector<4x128xi32> to vector<1x128xi32>
    %c8_i32_24 = arith.constant 8 : i32
    %69 = vector.broadcast %c8_i32_24 : i32 to vector<1x128xi32>
    %70 = arith.subi %68, %69 : vector<1x128xi32>
    %71 = vector.broadcast %70 : vector<1x128xi32> to vector<8x128xi32>
    %72 = arith.cmpi eq, %3, %71 : vector<8x128xi32>
    %cst_25 = arith.constant 1.000000e+00 : f32
    %cst_26 = arith.constant 0.000000e+00 : f32
    %73 = vector.broadcast %cst_25 : f32 to vector<8x128xf32>
    %74 = vector.broadcast %cst_26 : f32 to vector<8x128xf32>
    %75 = arith.select %72, %73, %74 : vector<8x128xi1>, vector<8x128xf32>
    %76 = arith.addf %67, %75 : vector<8x128xf32>
    %77 = vector.extract_strided_slice %0 {offsets = [3, 0], sizes = [1, 128], strides = [1, 1]} : vector<4x128xi32> to vector<1x128xi32>
    %c8_i32_27 = arith.constant 8 : i32
    %78 = vector.broadcast %c8_i32_27 : i32 to vector<1x128xi32>
    %79 = arith.subi %77, %78 : vector<1x128xi32>
    %80 = vector.broadcast %79 : vector<1x128xi32> to vector<8x128xi32>
    %81 = arith.cmpi eq, %3, %80 : vector<8x128xi32>
    %cst_28 = arith.constant 1.000000e+00 : f32
    %cst_29 = arith.constant 0.000000e+00 : f32
    %82 = vector.broadcast %cst_28 : f32 to vector<8x128xf32>
    %83 = vector.broadcast %cst_29 : f32 to vector<8x128xf32>
    %84 = arith.select %81, %82, %83 : vector<8x128xi1>, vector<8x128xf32>
    %85 = arith.addf %76, %84 : vector<8x128xf32>
    %86 = vector.extract_strided_slice %1 {offsets = [0, 1], sizes = [8, 1], strides = [1, 1]} : vector<8x3xf32> to vector<8x1xf32>
    %87 = vector.shape_cast %86 : vector<8x1xf32> to vector<8x1xf32>
    %88 = vector.broadcast %87 : vector<8x1xf32> to vector<8x128xf32>
    %89 = arith.mulf %85, %88 : vector<8x128xf32>
    %cst_30 = arith.constant dense<0.000000e+00> : vector<128xf32>
    %90 = vector.multi_reduction <add>, %89, %cst_30 [0] : vector<8x128xf32> to vector<128xf32>
    %91 = vector.shape_cast %90 : vector<128xf32> to vector<1x128xf32>
    %92 = arith.addf %48, %91 : vector<1x128xf32>
    %cst_31 = arith.constant 0.000000e+00 : f32
    %93 = vector.broadcast %cst_31 : f32 to vector<8x128xf32>
    %94 = vector.extract_strided_slice %0 {offsets = [0, 0], sizes = [1, 128], strides = [1, 1]} : vector<4x128xi32> to vector<1x128xi32>
    %c16_i32 = arith.constant 16 : i32
    %95 = vector.broadcast %c16_i32 : i32 to vector<1x128xi32>
    %96 = arith.subi %94, %95 : vector<1x128xi32>
    %97 = vector.broadcast %96 : vector<1x128xi32> to vector<8x128xi32>
    %98 = arith.cmpi eq, %3, %97 : vector<8x128xi32>
    %cst_32 = arith.constant 1.000000e+00 : f32
    %cst_33 = arith.constant 0.000000e+00 : f32
    %99 = vector.broadcast %cst_32 : f32 to vector<8x128xf32>
    %100 = vector.broadcast %cst_33 : f32 to vector<8x128xf32>
    %101 = arith.select %98, %99, %100 : vector<8x128xi1>, vector<8x128xf32>
    %102 = arith.addf %93, %101 : vector<8x128xf32>
    %103 = vector.extract_strided_slice %0 {offsets = [1, 0], sizes = [1, 128], strides = [1, 1]} : vector<4x128xi32> to vector<1x128xi32>
    %c16_i32_34 = arith.constant 16 : i32
    %104 = vector.broadcast %c16_i32_34 : i32 to vector<1x128xi32>
    %105 = arith.subi %103, %104 : vector<1x128xi32>
    %106 = vector.broadcast %105 : vector<1x128xi32> to vector<8x128xi32>
    %107 = arith.cmpi eq, %3, %106 : vector<8x128xi32>
    %cst_35 = arith.constant 1.000000e+00 : f32
    %cst_36 = arith.constant 0.000000e+00 : f32
    %108 = vector.broadcast %cst_35 : f32 to vector<8x128xf32>
    %109 = vector.broadcast %cst_36 : f32 to vector<8x128xf32>
    %110 = arith.select %107, %108, %109 : vector<8x128xi1>, vector<8x128xf32>
    %111 = arith.addf %102, %110 : vector<8x128xf32>
    %112 = vector.extract_strided_slice %0 {offsets = [2, 0], sizes = [1, 128], strides = [1, 1]} : vector<4x128xi32> to vector<1x128xi32>
    %c16_i32_37 = arith.constant 16 : i32
    %113 = vector.broadcast %c16_i32_37 : i32 to vector<1x128xi32>
    %114 = arith.subi %112, %113 : vector<1x128xi32>
    %115 = vector.broadcast %114 : vector<1x128xi32> to vector<8x128xi32>
    %116 = arith.cmpi eq, %3, %115 : vector<8x128xi32>
    %cst_38 = arith.constant 1.000000e+00 : f32
    %cst_39 = arith.constant 0.000000e+00 : f32
    %117 = vector.broadcast %cst_38 : f32 to vector<8x128xf32>
    %118 = vector.broadcast %cst_39 : f32 to vector<8x128xf32>
    %119 = arith.select %116, %117, %118 : vector<8x128xi1>, vector<8x128xf32>
    %120 = arith.addf %111, %119 : vector<8x128xf32>
    %121 = vector.extract_strided_slice %0 {offsets = [3, 0], sizes = [1, 128], strides = [1, 1]} : vector<4x128xi32> to vector<1x128xi32>
    %c16_i32_40 = arith.constant 16 : i32
    %122 = vector.broadcast %c16_i32_40 : i32 to vector<1x128xi32>
    %123 = arith.subi %121, %122 : vector<1x128xi32>
    %124 = vector.broadcast %123 : vector<1x128xi32> to vector<8x128xi32>
    %125 = arith.cmpi eq, %3, %124 : vector<8x128xi32>
    %cst_41 = arith.constant 1.000000e+00 : f32
    %cst_42 = arith.constant 0.000000e+00 : f32
    %126 = vector.broadcast %cst_41 : f32 to vector<8x128xf32>
    %127 = vector.broadcast %cst_42 : f32 to vector<8x128xf32>
    %128 = arith.select %125, %126, %127 : vector<8x128xi1>, vector<8x128xf32>
    %129 = arith.addf %120, %128 : vector<8x128xf32>
    %130 = vector.extract_strided_slice %1 {offsets = [0, 2], sizes = [8, 1], strides = [1, 1]} : vector<8x3xf32> to vector<8x1xf32>
    %131 = vector.shape_cast %130 : vector<8x1xf32> to vector<8x1xf32>
    %132 = vector.broadcast %131 : vector<8x1xf32> to vector<8x128xf32>
    %133 = arith.mulf %129, %132 : vector<8x128xf32>
    %cst_43 = arith.constant dense<0.000000e+00> : vector<128xf32>
    %134 = vector.multi_reduction <add>, %133, %cst_43 [0] : vector<8x128xf32> to vector<128xf32>
    %135 = vector.shape_cast %134 : vector<128xf32> to vector<1x128xf32>
    %136 = arith.addf %92, %135 : vector<1x128xf32>
    %137 = vector.broadcast %2 : vector<1x1xf32> to vector<1x128xf32>
    %138 = arith.addf %136, %137 : vector<1x128xf32>
    %c0_44 = arith.constant 0 : index
    %c0_45 = arith.constant 0 : index
    %139 = vector.load %arg4[%c0_44, %c0_45] : memref<1x128xf32, #tpu.memory_space<vmem>>, vector<1x128xf32>
    tpu.vector_store %arg4[%c0_44, %c0_45], %138 {strides = array<i32>} : memref<1x128xf32, #tpu.memory_space<vmem>>, vector<1x128xf32>,
    return
  }
  func.func @transform_0(%arg0: i32) -> (i32, i32) {
    %c0_i32 = arith.constant 0 : i32
    %c0_i32_0 = arith.constant 0 : i32
    return %c0_i32, %arg0 : i32, i32
  }
  func.func @transform_1(%arg0: i32) -> (i32, i32) {
    %c0_i32 = arith.constant 0 : i32
    %c0_i32_0 = arith.constant 0 : i32
    %c0_i32_1 = arith.constant 0 : i32
    return %c0_i32, %c0_i32_0 : i32, i32
  }
  func.func @transform_2(%arg0: i32) -> (i32, i32) {
    %c0_i32 = arith.constant 0 : i32
    %c0_i32_0 = arith.constant 0 : i32
    %c0_i32_1 = arith.constant 0 : i32
    return %c0_i32, %c0_i32_0 : i32, i32
  }
  func.func @transform_3(%arg0: i32) -> (i32, i32) {
    %c0_i32 = arith.constant 0 : i32
    %c0_i32_0 = arith.constant 0 : i32
    return %c0_i32, %arg0 : i32, i32
  }
}

</mosaic_0001>

<bundles_post_ra>
// kernel: tpu_custom_call.1
= control target key start
LH: loop header
LB: loop body
LE: loop exit
PB: predicated region body
PF: predicated region fallthrough
CT: control target
= control target key end

     0   :  { %s258_s0 = inlined_call_operand.vmem [shape: s32[4,128], index: 0, kind: input, shape index: {}]   ;;  %s259_s1 = inlined_call_operand.vmem [shape: f32[8,3], index: 1, kind: input, shape index: {}]   ;;  %s260_s2 = inlined_call_operand.<no memory space> [shape: f32[1,1], index: 2, kind: input, shape index: {}]   ;;  %s261_s3 = inlined_call_operand.hbm [shape: f32[1,128], index: 3, kind: output, shape index: {}]  }
   0x1   :  { %v8_v0 = vstv %s260_s2 }
   0x2   :  { %9 = vst [vmem:[#allocation2] sm:$0x1] %v8_v0 }
   0x3   :  { %v18_v1 = vld [vmem:[%s259_s1] sm:$0xff]  ;;  %v206_v2 = vmov 0   ;;  %v207_v3 = vmov 2  }
   0x4   :  { %177 = vset.pattern.permute.xlu0 %v206_v2  ;;  %179 = vset.pattern.permute.xlu1 %v207_v3 }
   0x5   :  { %10 = vsyncpa [#allocation4], 0  ;;  %52 = vperm.xlu0 %177, %v18_v1   ;;  %134 = vperm.xlu1 %179, %v18_v1   ;;  %v208_v5 = vmov 1   ;;  %v20_v6 = vlaneseq  ;;  %v17_v8 = vld [vmem:[%s258_s0] sm:$0xf]  ;;  %v209_v23 = vmov 0.0  }
   0x6   :  { %v171_v11 = vadd.s32 4294967280, %v17_v8  ;;  %v170_v17 = vadd.s32 4294967288, %v17_v8  ;;  %s210_s0 = smov [#allocation3]  }
   0x7   :  { %v21_v7 = vshrl.u32 %v20_v6, 7  ;;  %s162_s1 = sshll.u32 %s210_s0, 4  ;;  %s163_s1 = int_to_ptr.vmem [resolvable:$true] %s162_s1 }
   0x8   :  { %s182_s17 = scalar_lea.vmem %s163_s1, 16  ;;  %s186_s18 = scalar_lea.vmem %s163_s1, 32 }
   0x9   :  { %v19_v4 = vld [vmem:[#allocation2] sm:$0x1]  ;;  %178 = vset.pattern.permute.xlu0 %v208_v5  ;;  %180 = vset.pattern.permute.xlu1 %v206_v2  ;;  %v240_v9 = vsub.s32 0, %v21_v7  ;;  %v31_v10 = vsub.s32 1, %v21_v7  ;;  %v38_v12 = vsub.s32 2, %v21_v7  ;;  %v45_v18 = vsub.s32 3, %v21_v7  ;;  %p183_p0 = scmp.ne.s32.totalorder %s163_s1, %s182_s17  ;;  %p187_p1 = scmp.lt.s32.totalorder %s163_s1, %s163_s1 }
   0xa   :  { %93 = vperm.xlu0 %178, %v18_v1   ;;  %147 = vperm.xlu1 %180, %v19_v4   ;;  %p188_p2 = scmp.lt.s32.totalorder %s186_s18, %s182_s17 }
   0xb   :  { %v25_v13 = vrot.slane %v17_v8, %v240_v9  ;;  %v32_v14 = vrot.slane %v17_v8, %v31_v10  ;;  %v108_v15 = vrot.slane %v171_v11, %v240_v9  ;;  %v115_v16 = vrot.slane %v171_v11, %v31_v10 }
   0xc   :  { %v39_v19 = vrot.slane %v17_v8, %v38_v12  ;;  %v122_v20 = vrot.slane %v171_v11, %v38_v12  ;;  %v67_v21 = vrot.slane %v170_v17, %v240_v9  ;;  %v74_v22 = vrot.slane %v170_v17, %v31_v10  ;;  %p189_p3 = por %p188_p2, %p187_p1 }
   0xd   :  { %vm26_vm0 = vcmp.eq.s32.totalorder %v21_v7, %v25_v13  ;;  %vm33_vm1 = vcmp.eq.s32.totalorder %v21_v7, %v32_v14  ;;  %vm109_vm2 = vcmp.eq.s32.totalorder %v21_v7, %v108_v15  ;;  %vm116_vm3 = vcmp.eq.s32.totalorder %v21_v7, %v115_v16 }
   0xe   :  { %181 = vset.pattern.permute.xlu0 %v206_v2  ;;  %v27_v24 = vsel %vm26_vm0, 1.0, %v209_v23  ;;  %v34_v25 = vsel %vm33_vm1, 1.0, %v209_v23  ;;  %v110_v26 = vsel %vm109_vm2, 1.0, %v209_v23  ;;  %v117_v27 = vsel %vm116_vm3, 1.0, %v209_v23  ;;  %p190_p4 = pnand %p189_p3, %p183_p0 }
   0xf   :  { %vm40_vm4 = vcmp.eq.s32.totalorder %v21_v7, %v39_v19  ;;  %v46_v28 = vrot.slane %v17_v8, %v45_v18  ;;  %vm123_vm5 = vcmp.eq.s32.totalorder %v21_v7, %v122_v20  ;;  %v129_v29 = vrot.slane %v171_v11, %v45_v18 }
  0x10   :  { %vm68_vm6 = vcmp.eq.s32.totalorder %v21_v7, %v67_v21  ;;  %vm75_vm7 = vcmp.eq.s32.totalorder %v21_v7, %v74_v22  ;;  %v81_v30 = vrot.slane %v170_v17, %v38_v12  ;;  %v35_v31 = vadd.f32 %v34_v25, %v27_v24 }
  0x11   :  { %v118_v32 = vadd.f32 %v117_v27, %v110_v26  ;;  %v41_v33 = vsel %vm40_vm4, 1.0, %v209_v23  ;;  %v124_v34 = vsel %vm123_vm5, 1.0, %v209_v23  ;;  %vm47_vm8 = vcmp.eq.s32.totalorder %v21_v7, %v46_v28 }
  0x12   :  { %vm130_vm9 = vcmp.eq.s32.totalorder %v21_v7, %v129_v29  ;;  %v69_v35 = vsel %vm68_vm6, 1.0, %v209_v23  ;;  %v76_v36 = vsel %vm75_vm7, 1.0, %v209_v23  ;;  %vm82_vm10 = vcmp.eq.s32.totalorder %v21_v7, %v81_v30 }
  0x13   :  { %v88_v37 = vrot.slane %v170_v17, %v45_v18  ;;  %v42_v38 = vadd.f32 %v41_v33, %v35_v31  ;;  %v125_v39 = vadd.f32 %v124_v34, %v118_v32  ;;  %v48_v40 = vsel %vm47_vm8, 1.0, %v209_v23 }
  0x14   :  { %v131_v41 = vsel %vm130_vm9, 1.0, %v209_v23  ;;  %v77_v42 = vadd.f32 %v76_v36, %v69_v35  ;;  %v83_v43 = vsel %vm82_vm10, 1.0, %v209_v23 }
  0x15   :  { %vm89_vm11 = vcmp.eq.s32.totalorder %v21_v7, %v88_v37  ;;  %v49_v44 = vadd.f32 %v48_v40, %v42_v38  ;;  %v132_v45 = vadd.f32 %v131_v41, %v125_v39 }
  0x16   :  { %v84_v46 = vadd.f32 %v83_v43, %v77_v42  ;;  %v90_v47 = vsel %vm89_vm11, 1.0, %v209_v23 }
  0x18   :  { %v91_v52 = vadd.f32 %v90_v47, %v84_v46 }
  0x84   :  { %v53_v48 = vpop.permute.xlu0 %52  ;;  %v135_v49 = vpop.permute.xlu1 %134 }
  0x85   :  { %v55_v50 = vmul.f32 %v53_v48, %v49_v44  ;;  %v137_v51 = vmul.f32 %v135_v49, %v132_v45 }
  0x87   :  { %v56_v53 = vrot.slane %v55_v50, 4  ;;  %v138_v54 = vrot.slane %v137_v51, 4 }
  0x89   :  { %v57_v55 = vadd.f32 %v56_v53, %v55_v50  ;;  %v139_v56 = vadd.f32 %v138_v54, %v137_v51  ;;  %v94_v57 = vpop.permute.xlu0 %93  ;;  %v148_v6 = vpop.permute.xlu1 %147 }
  0x8a   :  { %v96_v58 = vmul.f32 %v94_v57, %v91_v52  ;;  %v153_v10 = vrot.slane %v148_v6, %v240_v9 }
  0x8b   :  { %v58_v59 = vrot.slane %v57_v55, 2  ;;  %v140_v60 = vrot.slane %v139_v56, 2 }
  0x8c   :  { %v97_v61 = vrot.slane %v96_v58, 4 }
  0x8d   :  { %v59_v62 = vadd.f32 %v58_v59, %v57_v55  ;;  %v141_v0 = vadd.f32 %v140_v60, %v139_v56 }
  0x8e   :  { %v98_v63 = vadd.f32 %v97_v61, %v96_v58 }
  0x8f   :  { %v60_v2 = vrot.slane %v59_v62, 1  ;;  %v142_v4 = vrot.slane %v141_v0, 1 }
  0x90   :  { %v99_v1 = vrot.slane %v98_v63, 2 }
  0x91   :  { %v61_v7 = vadd.f32 %v60_v2, %v59_v62  ;;  %v143_v12 = vadd.f32 %v142_v4, %v141_v0 }
  0x92   :  { %v100_v3 = vadd.f32 %v99_v1, %v98_v63 }
  0x94   :  { %v101_v5 = vrot.slane %v100_v3, 1 }
  0x96   :  { %v102_v8 = vadd.f32 %v101_v5, %v100_v3 }
  0x98   :  { %v103_v11 = vadd.f32 %v102_v8, %v61_v7 }
  0x9a   :  { %v144_v13 = vadd.f32 %v143_v12, %v103_v11 }
  0x9c   :  { %v154_v14 = vadd.f32 %v153_v10, %v144_v13 }
  0x9e   :  { %155 = vst [vmem:[#allocation3] sm:$0x1] %v154_v14 }
  0x9f   :  { %193 = shalt.err (!%p190_p4)
}
  0xa0   :  { %s194_s21 = scalar_lea.hbm %s261_s3, 16 }
  0xa1   :  { %p195_p5 = scmp.ne.s32.totalorder %s261_s3, %s194_s21  ;;  %p198_p6 = scmp.lt.u32.totalorder %s194_s21, %s261_s3 }
  0xa3   :  { %p200_p7 = pnand %p198_p6, %p195_p5 }
  0xa5   :  { %203 = shalt.err (!%p200_p7)
}
  0xa6   :  { %165 = dma.vmem_to_hbm [thread:$0]  %s163_s1, 16, %s261_s3, [#allocation4]  }
  0xa7   :  { %204 = dma.done.wait [#allocation4], 16  }
  0xa8   :  { %205 = vsyncadd [#allocation4], 4294967280 }
  0xa9   :  { %169 = vsyncpa [#allocation4], 1 }

</bundles_post_ra>
